<compile_context>
chip_gen: v6e
topology: v6e:2x2x1
jax: 0.10.0
libtpu: 0.0.40
codegen_flags: <defaults>
</compile_context>

<pallas_src>
import math

import jax
import jax.numpy as jnp
from jax.experimental import pallas as pl
from jax.experimental.pallas import tpu as pltpu

_SUBLANE = 8            # fp32 sublane granularity
_MAX_BATCH_TILE = 2048  # rows per grid step (per perf review)


def _round_up(n: int, m: int) -> int:
    return ((n + m - 1) // m) * m


def _cdiv(a: int, b: int) -> int:
    return (a + b - 1) // b


def _nn_ai_kernel(x_ref, wt_ref, b_ref, o_ref):
    """out = softmax(tanh(x @ W^T + b)) row-wise over the D_out axis."""
    x = x_ref[...]                       # (tb, d_in)       fp32
    wt = wt_ref[...]                     # (d_in, d_out)    fp32 (pre-transposed)
    b = b_ref[...]                       # (1, d_out)       fp32

    # Linear: (tb, d_in) @ (d_in, d_out) on the MXU, fp32 accumulation.
    y = jax.lax.dot_general(
        x, wt,
        dimension_numbers=(((1,), (0,)), ((), ())),
        preferred_element_type=jnp.float32,
    ) + b                                # (tb, d_out)

    t = jnp.tanh(y)

    # Numerically-stable softmax over the feature axis (no padded lanes to mask).
    m = jnp.max(t, axis=-1, keepdims=True)
    e = jnp.exp(t - m)
    o_ref[...] = e / jnp.sum(e, axis=-1, keepdims=True)


def _batched_forward(x, weight, bias):
    """x: (B, D_in); weight: (D_out, D_in); bias: (D_out,). Returns (B, D_out)."""
    B, d_in = x.shape
    d_out = weight.shape[0]
    assert weight.shape == (d_out, d_in)

    x = x.astype(jnp.float32)

    # Only padding: round the batch up to a sublane multiple (<= 7 rows) so the
    # batch tile (a multiple of 8) never exceeds the array's row extent.
    b_rows = _round_up(B, _SUBLANE)
    if b_rows != B:
        x = jnp.zeros((b_rows, d_in), jnp.float32).at[:B].set(x)

    # Adaptive batch tile: split across >= 2 grid steps when possible (v7x
    # megacore), cap at _MAX_BATCH_TILE, never larger than the row extent.
    tb = min(_round_up(_cdiv(b_rows, 2), _SUBLANE), _MAX_BATCH_TILE, b_rows)
    grid_n = _cdiv(b_rows, tb)  # ragged last block allowed (writes masked)

    # One-time wrapper-side transpose: MXU-friendly (d_in, d_out) orientation.
    w_t = jnp.transpose(weight).astype(jnp.float32)      # (d_in, d_out)
    bias2 = bias.astype(jnp.float32).reshape(1, d_out)   # (1, d_out)

    out = pl.pallas_call(
        _nn_ai_kernel,
        out_shape=jax.ShapeDtypeStruct((b_rows, d_out), jnp.float32),
        grid=(grid_n,),
        in_specs=[
            pl.BlockSpec((tb, d_in), lambda i: (i, 0)),      # x rows
            pl.BlockSpec((d_in, d_out), lambda i: (0, 0)),   # W^T (resident)
            pl.BlockSpec((1, d_out), lambda i: (0, 0)),      # bias (resident)
        ],
        out_specs=pl.BlockSpec((tb, d_out), lambda i: (i, 0)),
        compiler_params=pltpu.CompilerParams(
            dimension_semantics=("parallel",),  # v7x: rows split across both TCs
        ),
    )(x, w_t, bias2)

    return out[:B] if b_rows != B else out


@jax.jit
def neural_network_ai_forward(
    self_hand_tensor,
    opp_hand_cards,
    opp_hand_sizes,
    others_hand_cards,
    others_hand_sizes,
    fours,
    deck_size_tensor,
    weight,  # (D_out, D_in)  -- PyTorch nn.Linear convention
    bias,    # (D_out,)
):
    """Single game state, exactly the PyTorch forward semantics."""
    x = jnp.concatenate(
        [self_hand_tensor, opp_hand_cards, opp_hand_sizes,
         others_hand_cards, others_hand_sizes, fours, deck_size_tensor],
        axis=0,
    ).astype(jnp.float32)
    out = _batched_forward(x[None, :], weight, bias)
    return out[0]


@jax.jit
def neural_network_ai_forward_batched(
    self_hand_tensor,     # (B, n_ranks)
    opp_hand_cards,       # (B, n_ranks)
    opp_hand_sizes,       # (B, k1)
    others_hand_cards,    # (B, n_ranks)
    others_hand_sizes,    # (B, k2)
    fours,                # (B, n_ranks)
    deck_size_tensor,     # (B, 1)
    weight,
    bias,
):
    """Many game states in one pallas_call (amortizes launch + W DMA)."""
    x = jnp.concatenate(
        [self_hand_tensor, opp_hand_cards, opp_hand_sizes,
         others_hand_cards, others_hand_sizes, fours, deck_size_tensor],
        axis=1,
    ).astype(jnp.float32)
    return _batched_forward(x, weight, bias)


def _xavier_uniform(key, shape):
    # matches nn.init.xavier_uniform_ for a (fan_out, fan_in) Linear weight
    fan_out, fan_in = shape
    bound = math.sqrt(6.0 / (fan_in + fan_out))
    return jax.random.uniform(key, shape, jnp.float32, minval=-bound, maxval=bound)


if __name__ == "__main__":
    # small, game-plausible shapes: 13 card ranks, a few size scalars
    SELF_HAND = 13
    OPP_CARDS = 13
    OPP_SIZES = 1
    OTH_CARDS = 13
    OTH_SIZES = 3
    FOURS = 13
    DECK = 1
    D_IN = SELF_HAND + OPP_CARDS + OPP_SIZES + OTH_CARDS + OTH_SIZES + FOURS + DECK  # 57
    D_OUT = 13

    key = jax.random.PRNGKey(0)
    keys = jax.random.split(key, 24)

    # deterministic parameter init (synthetic; no checkpoint load)
    weight = _xavier_uniform(keys[0], (D_OUT, D_IN))
    b_bound = 1.0 / math.sqrt(D_IN)  # PyTorch Linear default bias init range
    bias = jax.random.uniform(keys[1], (D_OUT,), jnp.float32,
                              minval=-b_bound, maxval=b_bound)

    # ---- single game state (PyTorch-equivalent forward) ----
    self_hand = jax.random.uniform(keys[2], (SELF_HAND,), jnp.float32)
    opp_cards = jax.random.uniform(keys[3], (OPP_CARDS,), jnp.float32)
    opp_sizes = jax.random.uniform(keys[4], (OPP_SIZES,), jnp.float32)
    oth_cards = jax.random.uniform(keys[5], (OTH_CARDS,), jnp.float32)
    oth_sizes = jax.random.uniform(keys[6], (OTH_SIZES,), jnp.float32)
    fours = jax.random.uniform(keys[7], (FOURS,), jnp.float32)
    deck = jax.random.uniform(keys[8], (DECK,), jnp.float32)

    out1 = neural_network_ai_forward(
        self_hand, opp_cards, opp_sizes, oth_cards, oth_sizes, fours, deck,
        weight, bias,
    )
    out1 = jax.block_until_ready(out1)

    x_ref = jnp.concatenate([self_hand, opp_cards, opp_sizes, oth_cards,
                             oth_sizes, fours, deck])
    ref1 = jax.nn.softmax(jnp.tanh(x_ref @ weight.T + bias), axis=0)
    assert out1.shape == (D_OUT,)
    assert jnp.allclose(out1, ref1, atol=1e-5, rtol=1e-5)
    assert jnp.allclose(jnp.sum(out1), 1.0, atol=1e-5)

    # ---- batched game states (the perf-critical path) ----
    def make_batch(ks, B):
        return (jax.random.uniform(ks[0], (B, SELF_HAND), jnp.float32),
                jax.random.uniform(ks[1], (B, OPP_CARDS), jnp.float32),
                jax.random.uniform(ks[2], (B, OPP_SIZES), jnp.float32),
                jax.random.uniform(ks[3], (B, OTH_CARDS), jnp.float32),
                jax.random.uniform(ks[4], (B, OTH_SIZES), jnp.float32),
                jax.random.uniform(ks[5], (B, FOURS), jnp.float32),
                jax.random.uniform(ks[6], (B, DECK), jnp.float32))

    for batch, koff in ((300, 9), (37, 16)):  # even-split grid + ragged-tail grid
        parts = make_batch(keys[koff:koff + 7], batch)
        outB = neural_network_ai_forward_batched(*parts, weight, bias)
        outB = jax.block_until_ready(outB)

        xB = jnp.concatenate(parts, axis=1)
        refB = jax.nn.softmax(jnp.tanh(xB @ weight.T + bias), axis=-1)
        assert outB.shape == (batch, D_OUT)
        assert jnp.allclose(outB, refB, atol=1e-5, rtol=1e-5)
        assert jnp.allclose(jnp.sum(outB, axis=-1), jnp.ones((batch,)), atol=1e-5)

    print("KERNEL_OK")
</pallas_src>

<mosaic_0001>
module attributes {stable_mosaic.version = 11 : i64} {
  func.func @_nn_ai_kernel(%arg0: i32, %arg1: memref<8x57xf32, #tpu.memory_space<vmem>>, %arg2: memref<57x13xf32, #tpu.memory_space<vmem>>, %arg3: memref<1x13xf32, #tpu.memory_space<vmem>>, %arg4: memref<8x13xf32, #tpu.memory_space<vmem>>) attributes {dimension_semantics = [#tpu.dimension_semantics<parallel>], iteration_bounds = array<i64: 1>, scalar_prefetch = 0 : i64, scratch_operands = 0 : i64, tpu.core_type = #tpu.core_type<tc>, window_params = [{transform_indices = @transform_0, window_bounds = array<i64: 8, 57>}, {pipeline_mode = #tpu.pipeline_mode<synchronous>, transform_indices = @transform_1, window_bounds = array<i64: 57, 13>}, {pipeline_mode = #tpu.pipeline_mode<synchronous>, transform_indices = @transform_2, window_bounds = array<i64: 1, 13>}, {transform_indices = @transform_3, window_bounds = array<i64: 8, 13>}]} {
    %c0 = arith.constant 0 : index
    %c0_0 = arith.constant 0 : index
    %0 = vector.load %arg1[%c0, %c0_0] : memref<8x57xf32, #tpu.memory_space<vmem>>, vector<8x57xf32>
    %c0_1 = arith.constant 0 : index
    %c0_2 = arith.constant 0 : index
    %1 = vector.load %arg2[%c0_1, %c0_2] : memref<57x13xf32, #tpu.memory_space<vmem>>, vector<57x13xf32>
    %c0_3 = arith.constant 0 : index
    %c0_4 = arith.constant 0 : index
    %2 = vector.load %arg3[%c0_3, %c0_4] : memref<1x13xf32, #tpu.memory_space<vmem>>, vector<1x13xf32>
    %cst = arith.constant dense<0.000000e+00> : vector<8x13xf32>
    %3 = tpu.matmul %0, %1, %cst {dimension_numbers = #tpu.dot_dimension_numbers<[1], [0], [0], [1], [0, 0, 1, 1], [], []>} : vector<8x57xf32>, vector<57x13xf32>, vector<8x13xf32> -> vector<8x13xf32>
    %4 = vector.broadcast %2 : vector<1x13xf32> to vector<8x13xf32>
    %5 = arith.addf %3, %4 : vector<8x13xf32>
    %6 = math.tanh %5 : vector<8x13xf32>
    %cst_5 = arith.constant dense<0xFF800000> : vector<8xf32>
    %7 = vector.multi_reduction <maximumf>, %6, %cst_5 [1] : vector<8x13xf32> to vector<8xf32>
    %8 = vector.shape_cast %7 : vector<8xf32> to vector<8x1xf32>
    %9 = vector.broadcast %8 : vector<8x1xf32> to vector<8x13xf32>
    %10 = arith.subf %6, %9 : vector<8x13xf32>
    %11 = math.exp %10 : vector<8x13xf32>
    %cst_6 = arith.constant dense<0.000000e+00> : vector<8xf32>
    %12 = vector.multi_reduction <add>, %11, %cst_6 [1] : vector<8x13xf32> to vector<8xf32>
    %13 = vector.shape_cast %12 : vector<8xf32> to vector<8x1xf32>
    %14 = vector.broadcast %13 : vector<8x1xf32> to vector<8x13xf32>
    %15 = arith.divf %11, %14 : vector<8x13xf32>
    %c0_7 = arith.constant 0 : index
    %c0_8 = arith.constant 0 : index
    %16 = vector.load %arg4[%c0_7, %c0_8] : memref<8x13xf32, #tpu.memory_space<vmem>>, vector<8x13xf32>
    tpu.vector_store %arg4[%c0_7, %c0_8], %15 {strides = array<i32>} : memref<8x13xf32, #tpu.memory_space<vmem>>, vector<8x13xf32>,
    return
  }
  func.func @transform_0(%arg0: i32) -> (i32, i32) {
    %c0_i32 = arith.constant 0 : i32
    %c0_i32_0 = arith.constant 0 : i32
    return %arg0, %c0_i32 : i32, i32
  }
  func.func @transform_1(%arg0: i32) -> (i32, i32) {
    %c0_i32 = arith.constant 0 : i32
    %c0_i32_0 = arith.constant 0 : i32
    %c0_i32_1 = arith.constant 0 : i32
    return %c0_i32, %c0_i32_0 : i32, i32
  }
  func.func @transform_2(%arg0: i32) -> (i32, i32) {
    %c0_i32 = arith.constant 0 : i32
    %c0_i32_0 = arith.constant 0 : i32
    %c0_i32_1 = arith.constant 0 : i32
    return %c0_i32, %c0_i32_0 : i32, i32
  }
  func.func @transform_3(%arg0: i32) -> (i32, i32) {
    %c0_i32 = arith.constant 0 : i32
    %c0_i32_0 = arith.constant 0 : i32
    return %arg0, %c0_i32 : i32, i32
  }
}

</mosaic_0001>

<bundles_post_ra>
// kernel: neural_network_ai_forward.1
= control target key start
LH: loop header
LB: loop body
LE: loop exit
PB: predicated region body
PF: predicated region fallthrough
CT: control target
= control target key end

     0   :  { %vm34_vm0 = vcmask 1040384   ;;  %v165_v0 = vmov 0.0   ;;  %vm166_vm1 = vmmov 0   ;;  %vm30_vm2 = vcmask 465920   ;;  %s223_s1 = inlined_call_operand.vmem [shape: f32[57,13], index: 1, kind: input, shape index: {}]   ;;  %s224_s0 = inlined_call_operand.vmem [shape: f32[8,57], index: 0, kind: input, shape index: {}]   ;;  %s225_s2 = inlined_call_operand.vmem [shape: f32[1,13], index: 2, kind: input, shape index: {}]   ;;  %s226_s3 = inlined_call_operand.vmem [shape: f32[8,13], index: 3, kind: output, shape index: {}]  }
   0x1   :  { %138 = vmatprep.subr.mxu0 %v165_v0  ;;  %v22_v1 = vld [vmem:[%s223_s1 + $0x38] sm:$0x1]  ;;  %v21_v2 = vld [vmem:[%s223_s1 + $0x30] sm:$0xff]  ;;  %154 = vmatprep.mubr.msk.f32.mxu0 %vm166_vm1, %v165_v0  ;;  %v20_v3 = vld [vmem:[%s223_s1 + $0x28] sm:$0xff]  ;;  %vm109_vm3 = vcmask 105472  }
   0x2   :  { %139 = vmatpush3.msk.msra.mxu0 %vm34_vm0, %v22_v1  ;;  %v19_v4 = vld [vmem:[%s223_s1 + $0x20] sm:$0xff]  ;;  %v18_v5 = vld [vmem:[%s223_s1 + $0x18] sm:$0xff]  ;;  %v17_v6 = vld [vmem:[%s223_s1 + $0x10] sm:$0xff] }
   0x3   :  { %140 = vmatprep.subr.mxu0 %v165_v0  ;;  %v16_v7 = vld [vmem:[%s223_s1 + $0x8] sm:$0xff]  ;;  %v15_v8 = vld [vmem:[%s223_s1] sm:$0xff] }
   0x4   :  { %141 = vmatpush3.msra.mxu0 %v21_v2  ;;  %v14_v9 = vld [vmem:[%s224_s0] sm:$0xff] }
   0x5   :  { %142 = vmatprep.subr.mxu0 %v165_v0  ;;  %v126_v10 = vld [vmem:[%s225_s2] ss:$0 sm:$0xff] }
   0x6   :  { %143 = vmatpush3.msra.mxu0 %v20_v3 }
   0x7   :  { %144 = vmatprep.subr.mxu0 %v165_v0 }
   0x8   :  { %145 = vmatpush3.msra.mxu0 %v19_v4 }
   0x9   :  { %146 = vmatprep.subr.mxu0 %v165_v0 }
   0xa   :  { %147 = vmatpush3.msra.mxu0 %v18_v5 }
   0xb   :  { %148 = vmatprep.subr.mxu0 %v165_v0 }
   0xc   :  { %149 = vmatpush3.msra.mxu0 %v17_v6 }
   0xd   :  { %150 = vmatprep.subr.mxu0 %v165_v0 }
   0xe   :  { %151 = vmatpush3.msra.mxu0 %v16_v7 }
   0xf   :  { %152 = vmatprep.subr.mxu0 %v165_v0 }
  0x10   :  { %153 = vmatpush3.msra.mxu0 %v15_v8 }
  0x11   :  { %155 = vmatmul.mubr.msk.f32.vlgmr.msra.gmra.mxu0 %vm30_vm2, %v14_v9 }
  0xd1   :  { %v104_v11 = vpop.f32.mrf.mxu0 }
  0xd2   :  { %v105_v12 = vadd.f32 %v126_v10, %v104_v11 }
  0xd3   :  { %v156_v13 = vpop.f32.mrf.mxu0 }
  0xd4   :  { %159 = vtanh.f32 %v105_v12 }
  0xe1   :  { %v160_v14 = vpop.eup %159 }
  0xe2   :  { %v110_v15 = vsel %vm109_vm3, %v160_v14, -inf }
  0xe3   :  { %111 = vmax.xlane.f32.xlu0 %v110_v15 }
 0x16c   :  { %v112_v16 = vpop.xlane.xlu0 %111 }
 0x16d   :  { %v113_v17 = vsub.f32 %v160_v14, %v112_v16 }
 0x16f   :  { %v114_v18 = vmul.f32 1.442695, %v113_v17 }
 0x171   :  { %161 = vpow2.f32 %v114_v18 }
 0x17e   :  { %v162_v19 = vpop.eup %161 }
 0x17f   :  { %v116_v20 = vsel %vm109_vm3, %v162_v19, 0.0 }
 0x180   :  { %117 = vadd.xlane.f32.xlu0 %v116_v20 }
 0x209   :  { %v118_v21 = vpop.xlane.xlu0 %117 }
 0x20a   :  { %163 = vrcp.f32 %v118_v21 }
 0x217   :  { %v164_v22 = vpop.eup %163 }
 0x218   :  { %v120_v23 = vmul.f32 %v164_v22, %v162_v19 }
 0x21a   :  { %121 = vst.msk [vmem:[%s226_s3] sm:$0xff] %vm109_vm3, %v120_v23 }

</bundles_post_ra>
